<compile_context>
chip_gen: v6e
topology: v6e:2x2x1
jax: 0.10.0
libtpu: 0.0.40
codegen_flags: <defaults>
</compile_context>

<pallas_src>
import jax
import jax.numpy as jnp
from jax.experimental import pallas as pl
from jax.experimental.pallas import tpu as pltpu  # kept for compiler knobs if shapes grow

EPS = 1e-5
NEG_SLOPE = 0.01


def _gcn_kernel(a_ref, x_ref, wb_ref, gb_ref, o_ref):
    """Single invocation; everything VMEM-resident.

    a_ref : (B*R, B*R)  block-diagonal adjacency (built in the wrapper)
    x_ref : (B*R, Fin)  features flattened over batch
    wb_ref: (Fin+1, Fout) = [W^T ; bias]   (one DMA instead of two)
    gb_ref: (2*R, 1)      = [gamma ; beta] (one DMA instead of two)
    o_ref : (B*R, Fout)   output; wrapper reshapes to (B, R, Fout)
    """
    BR, Fout = o_ref.shape
    Fin = x_ref.shape[1]
    R = gb_ref.shape[0] // 2
    B = BR // R

    # Unpack the consolidated parameter arrays (static, tile-aligned slices).
    w_t = wb_ref[0:Fin, :]            # (Fin, Fout)
    bias = wb_ref[Fin:Fin + 1, :]     # (1, Fout)
    gamma = gb_ref[0:R, :]            # (R, 1)
    beta = gb_ref[R:2 * R, :]         # (R, 1)

    # Linear reassociated as A @ (X @ W^T) + b, batch folded into two matmuls.
    xw = jnp.dot(x_ref[...], w_t, preferred_element_type=jnp.float32)   # (BR, Fout)
    h = jnp.dot(a_ref[...], xw, preferred_element_type=jnp.float32) + bias

    # BatchNorm1d(R), training-mode batch statistics: per region r reduce over
    # (batch, feature).  Rows of h are ordered b*R + r, so region r's samples
    # sit in rows {r, r+R, ...}: lane-reduce each (R, Fout) batch slab, then
    # combine slab partials.  Two-pass mean/var for numerical safety.
    inv_n = 1.0 / (B * Fout)
    slabs = [h[b * R:(b + 1) * R, :] for b in range(B)]                  # (R, Fout) each
    mean = sum(jnp.sum(s, axis=-1, keepdims=True) for s in slabs) * inv_n        # (R, 1)
    diffs = [s - mean for s in slabs]
    var = sum(jnp.sum(d * d, axis=-1, keepdims=True) for d in diffs) * inv_n     # (R, 1)

    # y = (h - mean) * rsqrt(var + eps) * gamma + beta, then LeakyReLU(0.01).
    scale = jax.lax.rsqrt(var + EPS) * gamma                                     # (R, 1)
    for b in range(B):
        y = diffs[b] * scale + beta
        o_ref[b * R:(b + 1) * R, :] = jnp.where(y >= 0, y, NEG_SLOPE * y).astype(o_ref.dtype)


def vanilla_gcn(features, adj, w, b, gamma, beta):
    """features: [B,R,Fin], adj: [B,R,R], w: nn.Linear weight [Fout,Fin],
    b: nn.Linear bias [Fout], gamma/beta: BatchNorm1d weight/bias [R]."""
    B, R, Fin = features.shape
    Fout = w.shape[0]
    f32 = jnp.float32

    # Wrapper-side layout plumbing (free XLA ops; no in-kernel relayout).
    x2d = features.astype(f32).reshape(B * R, Fin)
    a_blk = jax.scipy.linalg.block_diag(*[adj[i].astype(f32) for i in range(B)])
    wb = jnp.concatenate([w.T.astype(f32), b.astype(f32).reshape(1, Fout)], axis=0)
    gb = jnp.concatenate([gamma.astype(f32).reshape(R, 1),
                          beta.astype(f32).reshape(R, 1)], axis=0)

    out2d = pl.pallas_call(
        _gcn_kernel,
        out_shape=jax.ShapeDtypeStruct((B * R, Fout), f32),
        # No grid: single step, full arrays resident in VMEM (default specs).
    )(a_blk, x2d, wb, gb)

    return out2d.reshape(B, R, Fout)


def vanilla_gcn_ref(features, adj, w, b, gamma, beta):
    h = jnp.einsum("brk,bkf->brf", adj, features)
    h = jnp.einsum("brf,of->bro", h, w) + b[None, None, :]
    mean = jnp.mean(h, axis=(0, 2), keepdims=True)
    var = jnp.mean(jnp.square(h - mean), axis=(0, 2), keepdims=True)
    y = (h - mean) * jax.lax.rsqrt(var + EPS)
    y = y * gamma[None, :, None] + beta[None, :, None]
    return jnp.where(y >= 0, y, NEG_SLOPE * y)


if __name__ == "__main__":
    # Small shapes consistent with the module: region_size=8, features_in=16,
    # features_out=32, batch=2.
    B, R, Fin, Fout = 2, 8, 16, 32
    key = jax.random.PRNGKey(0)
    k1, k2, k3, k4 = jax.random.split(key, 4)

    features = jax.random.normal(k1, (B, R, Fin), dtype=jnp.float32)
    adj = jax.random.uniform(k2, (B, R, R), dtype=jnp.float32)

    # Deterministic synthetic parameters matching nn.Linear / BatchNorm1d init.
    bound = 1.0 / (Fin ** 0.5)
    w = jax.random.uniform(k3, (Fout, Fin), minval=-bound, maxval=bound,
                           dtype=jnp.float32)        # nn.Linear weight [Fout, Fin]
    b = jax.random.uniform(k4, (Fout,), minval=-bound, maxval=bound,
                           dtype=jnp.float32)        # nn.Linear bias [Fout]
    gamma = jnp.ones((R,), dtype=jnp.float32)        # BatchNorm1d weight init
    beta = jnp.zeros((R,), dtype=jnp.float32)        # BatchNorm1d bias init

    out = vanilla_gcn(features, adj, w, b, gamma, beta)
    out = jax.block_until_ready(out)

    ref = vanilla_gcn_ref(features, adj, w, b, gamma, beta)
    assert out.shape == (B, R, Fout)
    assert jnp.allclose(out, ref, atol=1e-4, rtol=1e-4), "mismatch vs JAX reference"

    print("KERNEL_OK")
</pallas_src>

<mosaic_0001>
module attributes {stable_mosaic.version = 11 : i64} {
  func.func @_gcn_kernel(%arg0: memref<16x16xf32, #tpu.memory_space<vmem>>, %arg1: memref<16x16xf32, #tpu.memory_space<vmem>>, %arg2: memref<17x32xf32, #tpu.memory_space<vmem>>, %arg3: memref<16x1xf32, #tpu.memory_space<vmem>>, %arg4: memref<16x32xf32, #tpu.memory_space<vmem>>) attributes {dimension_semantics = [], scalar_prefetch = 0 : i64, scratch_operands = 0 : i64, tpu.core_type = #tpu.core_type<tc>} {
    %c0 = arith.constant 0 : index
    %c0_0 = arith.constant 0 : index
    %0 = vector.load %arg2[%c0, %c0_0] : memref<17x32xf32, #tpu.memory_space<vmem>>, vector<16x32xf32>
    %c16 = arith.constant 16 : index
    %c0_1 = arith.constant 0 : index
    %1 = vector.load %arg2[%c16, %c0_1] : memref<17x32xf32, #tpu.memory_space<vmem>>, vector<1x32xf32>
    %c0_2 = arith.constant 0 : index
    %c0_3 = arith.constant 0 : index
    %2 = vector.load %arg3[%c0_2, %c0_3] : memref<16x1xf32, #tpu.memory_space<vmem>>, vector<8x1xf32>
    %c8 = arith.constant 8 : index
    %c0_4 = arith.constant 0 : index
    %3 = vector.load %arg3[%c8, %c0_4] : memref<16x1xf32, #tpu.memory_space<vmem>>, vector<8x1xf32>
    %c0_5 = arith.constant 0 : index
    %c0_6 = arith.constant 0 : index
    %4 = vector.load %arg1[%c0_5, %c0_6] : memref<16x16xf32, #tpu.memory_space<vmem>>, vector<16x16xf32>
    %cst = arith.constant dense<0.000000e+00> : vector<16x32xf32>
    %5 = tpu.matmul %4, %0, %cst {dimension_numbers = #tpu.dot_dimension_numbers<[1], [0], [0], [1], [0, 0, 1, 1], [], []>} : vector<16x16xf32>, vector<16x32xf32>, vector<16x32xf32> -> vector<16x32xf32>
    %c0_7 = arith.constant 0 : index
    %c0_8 = arith.constant 0 : index
    %6 = vector.load %arg0[%c0_7, %c0_8] : memref<16x16xf32, #tpu.memory_space<vmem>>, vector<16x16xf32>
    %cst_9 = arith.constant dense<0.000000e+00> : vector<16x32xf32>
    %7 = tpu.matmul %6, %5, %cst_9 {dimension_numbers = #tpu.dot_dimension_numbers<[1], [0], [0], [1], [0, 0, 1, 1], [], []>} : vector<16x16xf32>, vector<16x32xf32>, vector<16x32xf32> -> vector<16x32xf32>
    %8 = vector.broadcast %1 : vector<1x32xf32> to vector<16x32xf32>
    %9 = arith.addf %7, %8 : vector<16x32xf32>
    %10 = vector.extract_strided_slice %9 {offsets = [0, 0], sizes = [8, 32], strides = [1, 1]} : vector<16x32xf32> to vector<8x32xf32>
    %11 = vector.extract_strided_slice %9 {offsets = [8, 0], sizes = [8, 32], strides = [1, 1]} : vector<16x32xf32> to vector<8x32xf32>
    %cst_10 = arith.constant dense<0.000000e+00> : vector<8xf32>
    %12 = vector.multi_reduction <add>, %10, %cst_10 [1] : vector<8x32xf32> to vector<8xf32>
    %13 = vector.shape_cast %12 : vector<8xf32> to vector<8x1xf32>
    %cst_11 = arith.constant 0.000000e+00 : f32
    %14 = vector.broadcast %cst_11 : f32 to vector<8x1xf32>
    %15 = arith.addf %14, %13 : vector<8x1xf32>
    %cst_12 = arith.constant dense<0.000000e+00> : vector<8xf32>
    %16 = vector.multi_reduction <add>, %11, %cst_12 [1] : vector<8x32xf32> to vector<8xf32>
    %17 = vector.shape_cast %16 : vector<8xf32> to vector<8x1xf32>
    %18 = arith.addf %15, %17 : vector<8x1xf32>
    %cst_13 = arith.constant 1.562500e-02 : f32
    %19 = vector.broadcast %cst_13 : f32 to vector<8x1xf32>
    %20 = arith.mulf %18, %19 : vector<8x1xf32>
    %21 = vector.broadcast %20 : vector<8x1xf32> to vector<8x32xf32>
    %22 = arith.subf %10, %21 : vector<8x32xf32>
    %23 = vector.broadcast %20 : vector<8x1xf32> to vector<8x32xf32>
    %24 = arith.subf %11, %23 : vector<8x32xf32>
    %25 = arith.mulf %22, %22 : vector<8x32xf32>
    %cst_14 = arith.constant dense<0.000000e+00> : vector<8xf32>
    %26 = vector.multi_reduction <add>, %25, %cst_14 [1] : vector<8x32xf32> to vector<8xf32>
    %27 = vector.shape_cast %26 : vector<8xf32> to vector<8x1xf32>
    %cst_15 = arith.constant 0.000000e+00 : f32
    %28 = vector.broadcast %cst_15 : f32 to vector<8x1xf32>
    %29 = arith.addf %28, %27 : vector<8x1xf32>
    %30 = arith.mulf %24, %24 : vector<8x32xf32>
    %cst_16 = arith.constant dense<0.000000e+00> : vector<8xf32>
    %31 = vector.multi_reduction <add>, %30, %cst_16 [1] : vector<8x32xf32> to vector<8xf32>
    %32 = vector.shape_cast %31 : vector<8xf32> to vector<8x1xf32>
    %33 = arith.addf %29, %32 : vector<8x1xf32>
    %cst_17 = arith.constant 1.562500e-02 : f32
    %34 = vector.broadcast %cst_17 : f32 to vector<8x1xf32>
    %35 = arith.mulf %33, %34 : vector<8x1xf32>
    %cst_18 = arith.constant 9.99999974E-6 : f32
    %36 = vector.broadcast %cst_18 : f32 to vector<8x1xf32>
    %37 = arith.addf %35, %36 : vector<8x1xf32>
    %38 = math.rsqrt %37 : vector<8x1xf32>
    %39 = arith.mulf %38, %2 : vector<8x1xf32>
    %40 = vector.broadcast %39 : vector<8x1xf32> to vector<8x32xf32>
    %41 = arith.mulf %22, %40 : vector<8x32xf32>
    %42 = vector.broadcast %3 : vector<8x1xf32> to vector<8x32xf32>
    %43 = arith.addf %41, %42 : vector<8x32xf32>
    %cst_19 = arith.constant 0.000000e+00 : f32
    %44 = vector.broadcast %cst_19 : f32 to vector<8x32xf32>
    %45 = arith.cmpf oge, %43, %44 : vector<8x32xf32>
    %cst_20 = arith.constant 0.00999999977 : f32
    %46 = vector.broadcast %cst_20 : f32 to vector<8x32xf32>
    %47 = arith.mulf %46, %43 : vector<8x32xf32>
    %48 = arith.select %45, %43, %47 : vector<8x32xi1>, vector<8x32xf32>
    %c0_21 = arith.constant 0 : index
    %c0_22 = arith.constant 0 : index
    %49 = vector.load %arg4[%c0_21, %c0_22] : memref<16x32xf32, #tpu.memory_space<vmem>>, vector<8x32xf32>
    tpu.vector_store %arg4[%c0_21, %c0_22], %48 {strides = array<i32>} : memref<16x32xf32, #tpu.memory_space<vmem>>, vector<8x32xf32>,
    %50 = vector.broadcast %39 : vector<8x1xf32> to vector<8x32xf32>
    %51 = arith.mulf %24, %50 : vector<8x32xf32>
    %52 = vector.broadcast %3 : vector<8x1xf32> to vector<8x32xf32>
    %53 = arith.addf %51, %52 : vector<8x32xf32>
    %cst_23 = arith.constant 0.000000e+00 : f32
    %54 = vector.broadcast %cst_23 : f32 to vector<8x32xf32>
    %55 = arith.cmpf oge, %53, %54 : vector<8x32xf32>
    %cst_24 = arith.constant 0.00999999977 : f32
    %56 = vector.broadcast %cst_24 : f32 to vector<8x32xf32>
    %57 = arith.mulf %56, %53 : vector<8x32xf32>
    %58 = arith.select %55, %53, %57 : vector<8x32xi1>, vector<8x32xf32>
    %c8_25 = arith.constant 8 : index
    %c0_26 = arith.constant 0 : index
    %59 = vector.load %arg4[%c8_25, %c0_26] : memref<16x32xf32, #tpu.memory_space<vmem>>, vector<8x32xf32>
    tpu.vector_store %arg4[%c8_25, %c0_26], %58 {strides = array<i32>} : memref<16x32xf32, #tpu.memory_space<vmem>>, vector<8x32xf32>,
    return
  }
}

</mosaic_0001>

<bundles_post_ra>
// kernel: tpu_custom_call.1
= control target key start
LH: loop header
LB: loop body
LE: loop exit
PB: predicated region body
PF: predicated region fallthrough
CT: control target
= control target key end

     0   :  { %9 = vsyncpa [#allocation3], 0  ;;  %s462_s0 = inlined_call_operand.vmem [shape: f32[16,16], index: 0, kind: input, shape index: {}]   ;;  %s463_s1 = inlined_call_operand.hbm [shape: f32[16,16], index: 1, kind: input, shape index: {}]   ;;  %s464_s2 = inlined_call_operand.hbm [shape: f32[17,32], index: 2, kind: input, shape index: {}]   ;;  %s465_s3 = inlined_call_operand.vmem [shape: f32[16,1], index: 3, kind: input, shape index: {}]   ;;  %s466_s4 = inlined_call_operand.hbm [shape: f32[16,32], index: 4, kind: output, shape index: {}]  }
   0x1   :  { %10 = vsyncpa [#allocation6], 0 }
   0x2   :  { %11 = vsyncpa [#allocation4], 0  ;;  %s391_s15 = smov [#allocation2]  }
   0x3   :  { %s19_s16 = sshll.u32 %s391_s15, 4  ;;  %s20_s16 = int_to_ptr.vmem [resolvable:$true] %s19_s16 }
   0x4   :  { %s333_s17 = scalar_lea.vmem %s20_s16, 256  ;;  %p338_p1 = scmp.lt.s32.totalorder %s20_s16, %s20_s16 }
   0x5   :  { %p334_p0 = scmp.ne.s32.totalorder %s20_s16, %s333_s17  ;;  %p339_p2 = scmp.lt.s32.totalorder %s333_s17, %s333_s17 }
   0x7   :  { %p340_p3 = por %p339_p2, %p338_p1 }
   0x9   :  { %p341_p4 = pnand %p340_p3, %p334_p0 }
   0xb   :  { %344 = shalt.err (!%p341_p4)
}
   0xc   :  { %s392_s18 = smov 128   ;;  %s393_s19 = smov 8  }
   0xd   :  { %25 = dma.hbm_to_vmem [thread:$0]  %s463_s1, 256, %s20_s16, [#allocation3], %s392_s18, %s392_s18, %s393_s19  }
   0xe   :  { %s394_s22 = smov [#allocation5]  }
   0xf   :  { %s31_s23 = sshll.u32 %s394_s22, 4  ;;  %s32_s23 = int_to_ptr.vmem [resolvable:$true] %s31_s23 }
  0x10   :  { %s353_s24 = scalar_lea.vmem %s32_s23, 384  ;;  %p358_p6 = scmp.lt.s32.totalorder %s32_s23, %s32_s23 }
  0x11   :  { %p354_p5 = scmp.ne.s32.totalorder %s32_s23, %s353_s24  ;;  %p359_p7 = scmp.lt.s32.totalorder %s353_s24, %s353_s24 }
  0x13   :  { %p360_p8 = por %p359_p7, %p358_p6 }
  0x15   :  { %p361_p9 = pnand %p360_p8, %p354_p5 }
  0x17   :  { %364 = shalt.err (!%p361_p9)
}
  0x18   :  { %37 = dma.hbm_to_vmem [thread:$0]  %s464_s2, 384, %s32_s23, [#allocation6], %s392_s18, %s392_s18, %s393_s19  }
  0x19   :  { %385 = dma.done.wait [#allocation3], 256  }
  0x1a   :  { %386 = vsyncadd [#allocation3], 4294967040 }
  0x1b   :  { %387 = dma.done.wait [#allocation6], 384  }
  0x1c   :  { %388 = vsyncadd [#allocation6], 4294966912  ;;  %vm53_vm0 = vcmask 130048   ;;  %v47_v0 = vld [vmem:[#allocation5 + $0x8] sm:$0xff]  ;;  %v46_v1 = vld [vmem:[#allocation5] sm:$0xff]  ;;  %vm222_vm1 = vcmask 261120  }
  0x1d   :  { %v51_v2 = vld [vmem:[#allocation2] sm:$0xff]  ;;  %301 = vmatprep.subr.mxu0 %v47_v0  ;;  %v52_v3 = vld [vmem:[#allocation2 + $0x8] sm:$0xff]  ;;  %v395_v25 = vmov 0   ;;  %s396_s6 = smov [#allocation7]  }
  0x1e   :  { %305 = vmatprep.mubr.msk.f32.mxu0 %vm53_vm0, %v51_v2  ;;  %302 = vmatpush3.msra.mxu0 %v47_v0  ;;  %v135_v4 = vld [vmem:[%s462_s0] sm:$0xff]  ;;  %v136_v7 = vld [vmem:[%s462_s0 + $0x8] sm:$0xff]  ;;  %s275_s7 = sshll.u32 %s396_s6, 4  ;;  %s276_s7 = int_to_ptr.vmem [resolvable:$true] %s275_s7 }
  0x1f   :  { %303 = vmatprep.subr.mxu0 %v46_v1  ;;  %312 = vmatprep.mubr.msk.f32.mxu1 %vm53_vm0, %v135_v4  ;;  %v290_v9 = vld [vmem:[#allocation5 + $0x10] ss:$0 sm:$0xff]  ;;  %v50_v26 = vld [vmem:[%s465_s3 + $0x8] sm:$0xff]  ;;  %p370_p11 = scmp.lt.s32.totalorder %s276_s7, %s276_s7 }
  0x20   :  { %304 = vmatpush3.msra.mxu0 %v46_v1  ;;  %321 = vset.pattern.permute.xlu0 %v395_v25  ;;  %v49_v32 = vld [vmem:[%s465_s3] sm:$0xff]  ;;  %s365_s3 = scalar_lea.vmem %s276_s7, 256 }
  0x21   :  { %306 = vmatmul.mubr.msk.f32.vlgmr.msra.gmra.mxu0 %vm53_vm0, %v52_v3  ;;  %322 = vset.pattern.permute.xlu1 %v395_v25  ;;  %p366_p10 = scmp.ne.s32.totalorder %s276_s7, %s365_s3  ;;  %p371_p12 = scmp.lt.s32.totalorder %s365_s3, %s365_s3 }
  0x23   :  { %p372_p13 = por %p371_p12, %p370_p11 }
  0x25   :  { %p373_p0 = pnand %p372_p13, %p366_p10 }
  0xe1   :  { %v307_v5 = vpop.f32.mrf.mxu0 }
  0xe2   :  { %308 = vmatprep.subr.mxu1 %v307_v5 }
  0xe3   :  { %v126_v6 = vpop.f32.mrf.mxu0  ;;  %309 = vmatpush3.msra.mxu1 %v307_v5 }
  0xe4   :  { %310 = vmatprep.subr.mxu1 %v126_v6 }
  0xe5   :  { %311 = vmatpush3.msra.mxu1 %v126_v6 }
  0xe6   :  { %313 = vmatmul.mubr.msk.f32.vlgmr.msra.gmra.mxu1 %vm53_vm0, %v136_v7 }
 0x1a6   :  { %v314_v8 = vpop.f32.mrf.mxu1 }
 0x1a7   :  { %v219_v12 = vadd.f32 %v314_v8, %v290_v9 }
 0x1a8   :  { %v213_v10 = vpop.f32.mrf.mxu1 }
 0x1a9   :  { %v214_v11 = vadd.f32 %v290_v9, %v213_v10  ;;  %v227_v14 = vsel %vm222_vm1, %v219_v12, 0.0 }
 0x1ab   :  { %v223_v13 = vsel %vm222_vm1, %v214_v11, 0.0 }
 0x1ac   :  { %224 = vadd.xlane.f32.xlu0 %v223_v13 }
 0x1b0   :  { %228 = vadd.xlane.f32.xlu0 %v227_v14 }
 0x235   :  { %v225_v15 = vpop.xlane.xlu0 %224 }
 0x239   :  { %v229_v16 = vpop.xlane.xlu0 %228 }
 0x23a   :  { %v230_v17 = vadd.f32 %v229_v16, %v225_v15 }
 0x23c   :  { %v231_v18 = vmul.f32 0.015625, %v230_v17 }
 0x23e   :  { %v232_v19 = vsub.f32 %v214_v11, %v231_v18  ;;  %v233_v20 = vsub.f32 %v219_v12, %v231_v18 }
 0x240   :  { %v234_v21 = vmul.f32 %v232_v19, %v232_v19  ;;  %v239_v23 = vmul.f32 %v233_v20, %v233_v20 }
 0x242   :  { %v235_v22 = vsel %vm222_vm1, %v234_v21, 0.0  ;;  %v240_v24 = vsel %vm222_vm1, %v239_v23, 0.0 }
 0x243   :  { %236 = vadd.xlane.f32.xlu1 %v235_v22 }
 0x247   :  { %241 = vadd.xlane.f32.xlu1 %v240_v24 }
 0x258   :  { %256 = vperm.xlu1 %322, %v50_v26  }
 0x2cc   :  { %v237_v27 = vpop.xlane.xlu1 %236 }
 0x2d0   :  { %v242_v28 = vpop.xlane.xlu1 %241 }
 0x2d1   :  { %v243_v29 = vadd.f32 %v242_v28, %v237_v27 }
 0x2d3   :  { %v244_v30 = vmul.f32 0.015625, %v243_v29 }
 0x2d4   :  { %v257_v36 = vpop.permute.xlu1 %256 }
 0x2d5   :  { %v245_v31 = vadd.f32 1e-05, %v244_v30 }
 0x2d7   :  { %323 = vrsqrt.f32 %v245_v31 }
 0x2e4   :  { %v324_v33 = vpop.eup %323 }
 0x2e5   :  { %v247_v34 = vmul.f32 %v324_v33, %v49_v32 }
 0x2e7   :  { %250 = vperm.xlu0 %321, %v247_v34  }
 0x362   :  { %v251_v35 = vpop.permute.xlu0 %250 }
 0x363   :  { %v253_v37 = vmul.f32 %v251_v35, %v232_v19  ;;  %v264_v38 = vmul.f32 %v251_v35, %v233_v20 }
 0x365   :  { %v259_v39 = vadd.f32 %v257_v36, %v253_v37  ;;  %v265_v40 = vadd.f32 %v264_v38, %v257_v36 }
 0x367   :  { %vm260_vm2 = vcmp.ge.f32.partialorder %v259_v39, 0.0  ;;  %v261_v41 = vmul.f32 0.01, %v259_v39  ;;  %vm266_vm3 = vcmp.ge.f32.partialorder %v265_v40, 0.0  ;;  %v267_v42 = vmul.f32 0.01, %v265_v40 }
 0x369   :  { %v262_v43 = vsel %vm260_vm2, %v259_v39, %v261_v41  ;;  %v268_v44 = vsel %vm266_vm3, %v265_v40, %v267_v42 }
 0x36a   :  { %263 = vst.msk [vmem:[#allocation7] sm:$0xff] %vm222_vm1, %v262_v43  ;;  %269 = vst.msk [vmem:[#allocation7 + $0x8] sm:$0xff] %vm222_vm1, %v268_v44 }
 0x36b   :  { %376 = shalt.err (!%p373_p0)
}
 0x36c   :  { %281 = dma.vmem_to_hbm [thread:$0]  %s276_s7, 256, %s466_s4, [#allocation4], %s392_s18, %s392_s18, %s393_s19  }
 0x36d   :  { %389 = dma.done.wait [#allocation4], 256  }
 0x36e   :  { %390 = vsyncadd [#allocation4], 4294967040 }
 0x36f   :  { %285 = vsyncpa [#allocation3], 1 }
 0x370   :  { %286 = vsyncpa [#allocation6], 1 }
 0x371   :  { %287 = vsyncpa [#allocation4], 1 }

</bundles_post_ra>
